<compile_context>
chip_gen: v7x
topology: tpu7x:2x2x1
jax: 0.10.0
libtpu: 0.0.40
codegen_flags: <defaults>
</compile_context>

<pallas_src>
import functools

import jax
import jax.numpy as jnp
from jax.experimental import pallas as pl
from jax.experimental.pallas import tpu as pltpu


# ----------------------------------------------------------------------------
# helpers
# ----------------------------------------------------------------------------
def _choose_tm(m, tm_max=1024):
    """Row-tile size: full array if it fits, else a multiple of 16 (ideally
    dividing m exactly) up to tm_max; ragged last tile is masked by Pallas."""
    if m <= tm_max:
        return m
    top = tm_max - tm_max % 16
    for cand in range(top, 255, -16):
        if m % cand == 0:
            return cand
    return top


# ----------------------------------------------------------------------------
# kernels
# ----------------------------------------------------------------------------
def _matmul_bias_relu_kernel(x_ref, w_ref, b_ref, o_ref):
    """One row-tile of relu(x @ w + b): bf16 inputs, f32 accumulate, bf16 out."""
    y = jnp.dot(x_ref[...], w_ref[...], preferred_element_type=jnp.float32)
    y = jnp.maximum(y + b_ref[...], 0.0)
    o_ref[...] = y.astype(o_ref.dtype)


def _conv2_fc_kernel(p2_ref, w2_ref, b2_ref, wfc1_ref, bfc1_ref,
                     wfc2_ref, bfc2_ref, o_ref, *, n_pos, is_actor):
    """Fused conv2 (per output-position matmuls) + fc1 + fc2 (+ softmax) for
    one batch tile.  p2_ref: (bt, P2, 4*4*C1) bf16 conv2 patches."""
    bt = p2_ref.shape[0]
    hidden = bfc1_ref.shape[1]
    w2 = w2_ref[...]
    b2 = b2_ref[...]

    # fc1 pre-activation accumulated position-by-position so the (bt, P2*32)
    # flattened feature vector never needs to be materialized / relaid out.
    acc = jnp.zeros((bt, hidden), jnp.float32)
    for p in range(n_pos):
        xp = p2_ref[:, p, :]                                          # (bt, K2)
        y2p = jnp.dot(xp, w2, preferred_element_type=jnp.float32)     # (bt, C2)
        y2p = jnp.maximum(y2p + b2, 0.0)
        acc = acc + jnp.dot(y2p.astype(wfc1_ref.dtype), wfc1_ref[p],
                            preferred_element_type=jnp.float32)       # (bt, H)

    h = jnp.maximum(acc + bfc1_ref[...], 0.0)
    y = jnp.dot(h.astype(wfc2_ref.dtype), wfc2_ref[...],
                preferred_element_type=jnp.float32) + bfc2_ref[...]
    if is_actor:
        m = jnp.max(y, axis=-1, keepdims=True)
        e = jnp.exp(y - m)
        y = e / jnp.sum(e, axis=-1, keepdims=True)   # exact: probs sum to 1
    o_ref[0] = y.astype(o_ref.dtype)


# ----------------------------------------------------------------------------
# pallas wrappers
# ----------------------------------------------------------------------------
def conv_as_matmul(x, w, b, tm_max=1024):
    """relu(x @ w + b), row-tiled.  x (M, K) bf16, w (K, N) bf16, b (1, N) f32.
    Output is bf16 with only the N real channels (no lane padding in HBM)."""
    m, k = x.shape
    _, n = w.shape
    tm = _choose_tm(m, tm_max)
    return pl.pallas_call(
        _matmul_bias_relu_kernel,
        out_shape=jax.ShapeDtypeStruct((m, n), jnp.bfloat16),
        grid=(pl.cdiv(m, tm),),
        in_specs=[
            pl.BlockSpec((tm, k), lambda i: (i, 0)),
            pl.BlockSpec((k, n), lambda i: (0, 0)),
            pl.BlockSpec((1, n), lambda i: (0, 0)),
        ],
        out_specs=pl.BlockSpec((tm, n), lambda i: (i, 0)),
        compiler_params=pltpu.CompilerParams(
            dimension_semantics=("parallel",)),
    )(x, w, b)


def conv2_fc_head(p2, prep, is_actor):
    """Fused conv2 + fc1 + fc2 (+ softmax).  p2: (B, P2, K2) bf16 patches."""
    b_, p2n, k2 = p2.shape
    c2 = prep["w2"].shape[1]
    hidden = prep["bfc1"].shape[1]
    n_actions = prep["wfc2"].shape[1]

    bt = max(1, min(8, b_ // 2))          # grid >= 2 whenever B >= 2 (megacore)
    nbt = pl.cdiv(b_, bt)
    bp = nbt * bt
    if bp != b_:                          # tiny pad only when bt doesn't divide B
        p2 = jnp.pad(p2, ((0, bp - b_), (0, 0), (0, 0)))

    out = pl.pallas_call(
        functools.partial(_conv2_fc_kernel, n_pos=p2n, is_actor=is_actor),
        out_shape=jax.ShapeDtypeStruct((nbt, bt, n_actions), jnp.float32),
        grid=(nbt,),
        in_specs=[
            pl.BlockSpec((bt, p2n, k2), lambda i: (i, 0, 0)),      # patches
            pl.BlockSpec((k2, c2), lambda i: (0, 0)),              # w2
            pl.BlockSpec((1, c2), lambda i: (0, 0)),               # b2
            pl.BlockSpec((p2n, c2, hidden), lambda i: (0, 0, 0)),  # wfc1 (P2,32,256)
            pl.BlockSpec((1, hidden), lambda i: (0, 0)),           # bfc1
            pl.BlockSpec((hidden, n_actions), lambda i: (0, 0)),   # wfc2
            pl.BlockSpec((1, n_actions), lambda i: (0, 0)),        # bfc2
        ],
        out_specs=pl.BlockSpec((1, bt, n_actions), lambda i: (i, 0, 0)),
        compiler_params=pltpu.CompilerParams(
            dimension_semantics=("parallel",)),
    )(p2, prep["w2"], prep["b2"], prep["wfc1"], prep["bfc1"],
      prep["wfc2"], prep["bfc2"])
    return out.reshape(bp, n_actions)[:b_]


# ----------------------------------------------------------------------------
# host-side im2col (NHWC, feature order (kh, kw, c)); block-reshape fast path
# ----------------------------------------------------------------------------
def im2col_nhwc(x, k, stride):
    b, h, w, c = x.shape
    ho = (h - k) // stride + 1
    wo = (w - k) // stride + 1
    if k % stride == 0 and h % stride == 0 and w % stride == 0:
        q = k // stride
        xb = x.reshape(b, h // stride, stride, w // stride, stride, c)
        r = jnp.concatenate([xb[:, i:i + ho] for i in range(q)], axis=2)
        rc = jnp.concatenate([r[:, :, :, j:j + wo] for j in range(q)], axis=4)
        p = rc.transpose(0, 1, 3, 2, 4, 5)             # (B, Ho, Wo, k, k, C)
    else:
        cols = []
        for di in range(k):
            for dj in range(k):
                cols.append(x[:, di:di + stride * ho:stride,
                              dj:dj + stride * wo:stride, :])
        p = jnp.stack(cols, axis=3).reshape(b, ho, wo, k, k, c)
    return p.reshape(b, ho, wo, k * k * c), ho, wo


# ----------------------------------------------------------------------------
# parameters (PyTorch layout) + one-time matmul-ready preparation
# ----------------------------------------------------------------------------
def init_params(key, env_inputs, n_actions):
    in_c, in_h, in_w = env_inputs
    h1 = (in_h - 8) // 4 + 1
    w1 = (in_w - 8) // 4 + 1
    h2 = (h1 - 4) // 2 + 1
    w2 = (w1 - 4) // 2 + 1
    feat = 32 * h2 * w2                       # DQN_CNN_Model_Paper.feat_size
    ks = jax.random.split(key, 8)
    s = 0.05
    return {
        "w1": s * jax.random.normal(ks[0], (16, in_c, 8, 8), jnp.float32),
        "b1": s * jax.random.normal(ks[1], (16,), jnp.float32),
        "w2": s * jax.random.normal(ks[2], (32, 16, 4, 4), jnp.float32),
        "b2": s * jax.random.normal(ks[3], (32,), jnp.float32),
        "wfc1": s * jax.random.normal(ks[4], (256, feat), jnp.float32),
        "bfc1": s * jax.random.normal(ks[5], (256,), jnp.float32),
        "wfc2": s * jax.random.normal(ks[6], (n_actions, 256), jnp.float32),
        "bfc2": s * jax.random.normal(ks[7], (n_actions,), jnp.float32),
    }


def prepare_params(params, env_inputs):
    """Permute weights to matmul-ready layouts (bf16), keep biases f32."""
    in_c, in_h, in_w = env_inputs
    h1 = (in_h - 8) // 4 + 1
    w1 = (in_w - 8) // 4 + 1
    h2 = (h1 - 4) // 2 + 1
    w2 = (w1 - 4) // 2 + 1
    c1 = params["w1"].shape[0]
    c2 = params["w2"].shape[0]
    hidden = params["wfc1"].shape[0]
    bf16, f32 = jnp.bfloat16, jnp.float32

    # conv weights (Co, Ci, kh, kw) -> (kh*kw*Ci, Co), matching im2col order.
    w1m = params["w1"].transpose(0, 2, 3, 1).reshape(c1, -1).T.astype(bf16)
    w2m = params["w2"].transpose(0, 2, 3, 1).reshape(c2, -1).T.astype(bf16)
    # fc1 weight (256, 32*h2*w2), torch flatten order (c, h, w) -> reshaped to
    # (P2, C2, 256) so the kernel accumulates over conv2 output positions.
    wfc1_r = (params["wfc1"].reshape(hidden, c2, h2, w2)
              .transpose(2, 3, 1, 0).reshape(h2 * w2, c2, hidden).astype(bf16))
    return {
        "w1": w1m, "b1": params["b1"].reshape(1, -1).astype(f32),
        "w2": w2m, "b2": params["b2"].reshape(1, -1).astype(f32),
        "wfc1": wfc1_r, "bfc1": params["bfc1"].reshape(1, -1).astype(f32),
        "wfc2": params["wfc2"].T.astype(bf16),
        "bfc2": params["bfc2"].reshape(1, -1).astype(f32),
    }


# ----------------------------------------------------------------------------
# forward pass (semantics identical to the PyTorch module)
# ----------------------------------------------------------------------------
@functools.partial(jax.jit, static_argnames=("is_actor",))
def dqn_forward(prep, x, is_actor=False):
    """x: (B, C, H, W) float32, NCHW like the PyTorch module."""
    b = x.shape[0]
    xh = jnp.transpose(x, (0, 2, 3, 1)).astype(jnp.bfloat16)   # NHWC + bf16 once
    c1 = prep["w1"].shape[1]

    # conv1: 8x8 stride 4, 16 filters, ReLU (row-tiled matmul over patch rows)
    p1, h1, w1 = im2col_nhwc(xh, k=8, stride=4)
    y1 = conv_as_matmul(p1.reshape(b * h1 * w1, -1), prep["w1"], prep["b1"])
    y1 = y1.reshape(b, h1, w1, c1)                              # NHWC bf16

    # conv2 patches, then fused conv2 + fc1 + fc2 (+ softmax)
    p2, h2, w2 = im2col_nhwc(y1, k=4, stride=2)
    p2 = p2.reshape(b, h2 * w2, -1)
    return conv2_fc_head(p2, prep, is_actor)


# ----------------------------------------------------------------------------
# pure-JAX reference (NCHW, f32) for correctness checking
# ----------------------------------------------------------------------------
def reference_forward(params, x, is_actor=False):
    dn = ("NCHW", "OIHW", "NCHW")
    y = jax.lax.conv_general_dilated(x, params["w1"], (4, 4), "VALID",
                                     dimension_numbers=dn)
    y = jax.nn.relu(y + params["b1"][None, :, None, None])
    y = jax.lax.conv_general_dilated(y, params["w2"], (2, 2), "VALID",
                                     dimension_numbers=dn)
    y = jax.nn.relu(y + params["b2"][None, :, None, None])
    flat = y.reshape(y.shape[0], -1)
    h = jax.nn.relu(flat @ params["wfc1"].T + params["bfc1"])
    out = h @ params["wfc2"].T + params["bfc2"]
    if is_actor:
        out = jax.nn.softmax(out, axis=1)
    return out


if __name__ == "__main__":
    # Small shapes consistent with the module: batch=2, 4 stacked frames, 32x32
    # (32 -> conv1 -> 7 -> conv2 -> 2; feat = 32*2*2 = 128).
    env_inputs = (4, 32, 32)
    n_actions = 6
    B = 2

    key = jax.random.PRNGKey(0)
    kx, kp = jax.random.split(key)
    x = jax.random.normal(kx, (B,) + env_inputs, jnp.float32)
    params = init_params(kp, env_inputs, n_actions)
    prep = prepare_params(params, env_inputs)

    q_values = dqn_forward(prep, x, is_actor=False)
    q_values = jax.block_until_ready(q_values)
    assert q_values.shape == (B, n_actions)

    probs = dqn_forward(prep, x, is_actor=True)
    probs = jax.block_until_ready(probs)
    assert probs.shape == (B, n_actions)

    # loose tolerance: Pallas path uses bf16 activations/weights with f32
    # accumulation (documented precision difference vs the f32 reference).
    q_ref = reference_forward(params, x, is_actor=False)
    p_ref = reference_forward(params, x, is_actor=True)
    assert jnp.all(jnp.isfinite(q_values)) and jnp.all(jnp.isfinite(probs))
    assert jnp.allclose(q_values, q_ref, atol=5e-2, rtol=5e-2)
    assert jnp.allclose(probs, p_ref, atol=5e-2, rtol=5e-2)

    print("KERNEL_OK")
</pallas_src>

<mosaic_0001>
module attributes {stable_mosaic.version = 11 : i64} {
  func.func @_matmul_bias_relu_kernel(%arg0: i32, %arg1: memref<98x256xbf16, #tpu.memory_space<vmem>>, %arg2: memref<256x16xbf16, #tpu.memory_space<vmem>>, %arg3: memref<1x16xf32, #tpu.memory_space<vmem>>, %arg4: memref<98x16xbf16, #tpu.memory_space<vmem>>) attributes {dimension_semantics = [#tpu.dimension_semantics<parallel>], iteration_bounds = array<i64: 1>, scalar_prefetch = 0 : i64, scratch_operands = 0 : i64, tpu.core_type = #tpu.core_type<tc>, window_params = [{transform_indices = @transform_0, window_bounds = array<i64: 98, 256>}, {pipeline_mode = #tpu.pipeline_mode<synchronous>, transform_indices = @transform_1, window_bounds = array<i64: 256, 16>}, {pipeline_mode = #tpu.pipeline_mode<synchronous>, transform_indices = @transform_2, window_bounds = array<i64: 1, 16>}, {transform_indices = @transform_3, window_bounds = array<i64: 98, 16>}]} {
    %c0 = arith.constant 0 : index
    %c0_0 = arith.constant 0 : index
    %0 = vector.load %arg1[%c0, %c0_0] : memref<98x256xbf16, #tpu.memory_space<vmem>>, vector<98x256xbf16>
    %c0_1 = arith.constant 0 : index
    %c0_2 = arith.constant 0 : index
    %1 = vector.load %arg2[%c0_1, %c0_2] : memref<256x16xbf16, #tpu.memory_space<vmem>>, vector<256x16xbf16>
    %cst = arith.constant dense<0.000000e+00> : vector<98x16xf32>
    %2 = tpu.matmul %0, %1, %cst {dimension_numbers = #tpu.dot_dimension_numbers<[1], [0], [0], [1], [0, 0, 1, 1], [], []>} : vector<98x256xbf16>, vector<256x16xbf16>, vector<98x16xf32> -> vector<98x16xf32>
    %c0_3 = arith.constant 0 : index
    %c0_4 = arith.constant 0 : index
    %3 = vector.load %arg3[%c0_3, %c0_4] : memref<1x16xf32, #tpu.memory_space<vmem>>, vector<1x16xf32>
    %4 = vector.broadcast %3 : vector<1x16xf32> to vector<98x16xf32>
    %5 = arith.addf %2, %4 : vector<98x16xf32>
    %cst_5 = arith.constant 0.000000e+00 : f32
    %6 = vector.broadcast %cst_5 : f32 to vector<98x16xf32>
    %7 = arith.maximumf %5, %6 : vector<98x16xf32>
    %8 = arith.truncf %7 : vector<98x16xf32> to vector<98x16xbf16>
    %c0_6 = arith.constant 0 : index
    %c0_7 = arith.constant 0 : index
    %9 = vector.load %arg4[%c0_6, %c0_7] : memref<98x16xbf16, #tpu.memory_space<vmem>>, vector<98x16xbf16>
    tpu.vector_store %arg4[%c0_6, %c0_7], %8 {strides = array<i32>} : memref<98x16xbf16, #tpu.memory_space<vmem>>, vector<98x16xbf16>,
    return
  }
  func.func @transform_0(%arg0: i32) -> (i32, i32) {
    %c0_i32 = arith.constant 0 : i32
    %c0_i32_0 = arith.constant 0 : i32
    return %arg0, %c0_i32 : i32, i32
  }
  func.func @transform_1(%arg0: i32) -> (i32, i32) {
    %c0_i32 = arith.constant 0 : i32
    %c0_i32_0 = arith.constant 0 : i32
    %c0_i32_1 = arith.constant 0 : i32
    return %c0_i32, %c0_i32_0 : i32, i32
  }
  func.func @transform_2(%arg0: i32) -> (i32, i32) {
    %c0_i32 = arith.constant 0 : i32
    %c0_i32_0 = arith.constant 0 : i32
    %c0_i32_1 = arith.constant 0 : i32
    return %c0_i32, %c0_i32_0 : i32, i32
  }
  func.func @transform_3(%arg0: i32) -> (i32, i32) {
    %c0_i32 = arith.constant 0 : i32
    %c0_i32_0 = arith.constant 0 : i32
    return %arg0, %c0_i32 : i32, i32
  }
}

module attributes {stable_mosaic.version = 11 : i64} {
  func.func @_conv2_fc_kernel(%arg0: i32, %arg1: memref<1x4x256xbf16, #tpu.memory_space<vmem>>, %arg2: memref<256x32xbf16, #tpu.memory_space<vmem>>, %arg3: memref<1x32xf32, #tpu.memory_space<vmem>>, %arg4: memref<4x32x256xbf16, #tpu.memory_space<vmem>>, %arg5: memref<1x256xf32, #tpu.memory_space<vmem>>, %arg6: memref<256x6xbf16, #tpu.memory_space<vmem>>, %arg7: memref<1x6xf32, #tpu.memory_space<vmem>>, %arg8: memref<1x1x6xf32, #tpu.memory_space<vmem>>) attributes {dimension_semantics = [#tpu.dimension_semantics<parallel>], iteration_bounds = array<i64: 2>, scalar_prefetch = 0 : i64, scratch_operands = 0 : i64, tpu.core_type = #tpu.core_type<tc>, window_params = [{transform_indices = @transform_0, window_bounds = array<i64: 1, 4, 256>}, {pipeline_mode = #tpu.pipeline_mode<synchronous>, transform_indices = @transform_1, window_bounds = array<i64: 256, 32>}, {pipeline_mode = #tpu.pipeline_mode<synchronous>, transform_indices = @transform_2, window_bounds = array<i64: 1, 32>}, {pipeline_mode = #tpu.pipeline_mode<synchronous>, transform_indices = @transform_3, window_bounds = array<i64: 4, 32, 256>}, {pipeline_mode = #tpu.pipeline_mode<synchronous>, transform_indices = @transform_4, window_bounds = array<i64: 1, 256>}, {pipeline_mode = #tpu.pipeline_mode<synchronous>, transform_indices = @transform_5, window_bounds = array<i64: 256, 6>}, {pipeline_mode = #tpu.pipeline_mode<synchronous>, transform_indices = @transform_6, window_bounds = array<i64: 1, 6>}, {transform_indices = @transform_7, window_bounds = array<i64: 1, 1, 6>}]} {
    %c0 = arith.constant 0 : index
    %c0_0 = arith.constant 0 : index
    %0 = vector.load %arg2[%c0, %c0_0] : memref<256x32xbf16, #tpu.memory_space<vmem>>, vector<256x32xbf16>
    %c0_1 = arith.constant 0 : index
    %c0_2 = arith.constant 0 : index
    %1 = vector.load %arg3[%c0_1, %c0_2] : memref<1x32xf32, #tpu.memory_space<vmem>>, vector<1x32xf32>
    %cst = arith.constant 0.000000e+00 : f32
    %2 = vector.broadcast %cst : f32 to vector<1x256xf32>
    %c0_3 = arith.constant 0 : index
    %c0_4 = arith.constant 0 : index
    %c0_5 = arith.constant 0 : index
    %3 = vector.load %arg1[%c0_3, %c0_4, %c0_5] : memref<1x4x256xbf16, #tpu.memory_space<vmem>>, vector<1x1x256xbf16>
    %4 = vector.shape_cast %3 : vector<1x1x256xbf16> to vector<1x256xbf16>
    %cst_6 = arith.constant dense<0.000000e+00> : vector<1x32xf32>
    %5 = tpu.matmul %4, %0, %cst_6 {dimension_numbers = #tpu.dot_dimension_numbers<[1], [0], [0], [1], [0, 0, 1, 1], [], []>} : vector<1x256xbf16>, vector<256x32xbf16>, vector<1x32xf32> -> vector<1x32xf32>
    %6 = arith.addf %5, %1 : vector<1x32xf32>
    %cst_7 = arith.constant 0.000000e+00 : f32
    %7 = vector.broadcast %cst_7 : f32 to vector<1x32xf32>
    %8 = arith.maximumf %6, %7 : vector<1x32xf32>
    %9 = arith.truncf %8 : vector<1x32xf32> to vector<1x32xbf16>
    %c0_8 = arith.constant 0 : index
    %c0_9 = arith.constant 0 : index
    %c0_10 = arith.constant 0 : index
    %10 = vector.load %arg4[%c0_8, %c0_9, %c0_10] : memref<4x32x256xbf16, #tpu.memory_space<vmem>>, vector<1x32x256xbf16>
    %11 = vector.shape_cast %10 : vector<1x32x256xbf16> to vector<32x256xbf16>
    %cst_11 = arith.constant dense<0.000000e+00> : vector<1x256xf32>
    %12 = tpu.matmul %9, %11, %cst_11 {dimension_numbers = #tpu.dot_dimension_numbers<[1], [0], [0], [1], [0, 0, 1, 1], [], []>} : vector<1x32xbf16>, vector<32x256xbf16>, vector<1x256xf32> -> vector<1x256xf32>
    %13 = arith.addf %2, %12 : vector<1x256xf32>
    %c0_12 = arith.constant 0 : index
    %c1 = arith.constant 1 : index
    %c0_13 = arith.constant 0 : index
    %14 = vector.load %arg1[%c0_12, %c1, %c0_13] : memref<1x4x256xbf16, #tpu.memory_space<vmem>>, vector<1x1x256xbf16>
    %15 = vector.shape_cast %14 : vector<1x1x256xbf16> to vector<1x256xbf16>
    %cst_14 = arith.constant dense<0.000000e+00> : vector<1x32xf32>
    %16 = tpu.matmul %15, %0, %cst_14 {dimension_numbers = #tpu.dot_dimension_numbers<[1], [0], [0], [1], [0, 0, 1, 1], [], []>} : vector<1x256xbf16>, vector<256x32xbf16>, vector<1x32xf32> -> vector<1x32xf32>
    %17 = arith.addf %16, %1 : vector<1x32xf32>
    %cst_15 = arith.constant 0.000000e+00 : f32
    %18 = vector.broadcast %cst_15 : f32 to vector<1x32xf32>
    %19 = arith.maximumf %17, %18 : vector<1x32xf32>
    %20 = arith.truncf %19 : vector<1x32xf32> to vector<1x32xbf16>
    %c1_16 = arith.constant 1 : index
    %c0_17 = arith.constant 0 : index
    %c0_18 = arith.constant 0 : index
    %21 = vector.load %arg4[%c1_16, %c0_17, %c0_18] : memref<4x32x256xbf16, #tpu.memory_space<vmem>>, vector<1x32x256xbf16>
    %22 = vector.shape_cast %21 : vector<1x32x256xbf16> to vector<32x256xbf16>
    %cst_19 = arith.constant dense<0.000000e+00> : vector<1x256xf32>
    %23 = tpu.matmul %20, %22, %cst_19 {dimension_numbers = #tpu.dot_dimension_numbers<[1], [0], [0], [1], [0, 0, 1, 1], [], []>} : vector<1x32xbf16>, vector<32x256xbf16>, vector<1x256xf32> -> vector<1x256xf32>
    %24 = arith.addf %13, %23 : vector<1x256xf32>
    %c0_20 = arith.constant 0 : index
    %c2 = arith.constant 2 : index
    %c0_21 = arith.constant 0 : index
    %25 = vector.load %arg1[%c0_20, %c2, %c0_21] : memref<1x4x256xbf16, #tpu.memory_space<vmem>>, vector<1x1x256xbf16>
    %26 = vector.shape_cast %25 : vector<1x1x256xbf16> to vector<1x256xbf16>
    %cst_22 = arith.constant dense<0.000000e+00> : vector<1x32xf32>
    %27 = tpu.matmul %26, %0, %cst_22 {dimension_numbers = #tpu.dot_dimension_numbers<[1], [0], [0], [1], [0, 0, 1, 1], [], []>} : vector<1x256xbf16>, vector<256x32xbf16>, vector<1x32xf32> -> vector<1x32xf32>
    %28 = arith.addf %27, %1 : vector<1x32xf32>
    %cst_23 = arith.constant 0.000000e+00 : f32
    %29 = vector.broadcast %cst_23 : f32 to vector<1x32xf32>
    %30 = arith.maximumf %28, %29 : vector<1x32xf32>
    %31 = arith.truncf %30 : vector<1x32xf32> to vector<1x32xbf16>
    %c2_24 = arith.constant 2 : index
    %c0_25 = arith.constant 0 : index
    %c0_26 = arith.constant 0 : index
    %32 = vector.load %arg4[%c2_24, %c0_25, %c0_26] : memref<4x32x256xbf16, #tpu.memory_space<vmem>>, vector<1x32x256xbf16>
    %33 = vector.shape_cast %32 : vector<1x32x256xbf16> to vector<32x256xbf16>
    %cst_27 = arith.constant dense<0.000000e+00> : vector<1x256xf32>
    %34 = tpu.matmul %31, %33, %cst_27 {dimension_numbers = #tpu.dot_dimension_numbers<[1], [0], [0], [1], [0, 0, 1, 1], [], []>} : vector<1x32xbf16>, vector<32x256xbf16>, vector<1x256xf32> -> vector<1x256xf32>
    %35 = arith.addf %24, %34 : vector<1x256xf32>
    %c0_28 = arith.constant 0 : index
    %c3 = arith.constant 3 : index
    %c0_29 = arith.constant 0 : index
    %36 = vector.load %arg1[%c0_28, %c3, %c0_29] : memref<1x4x256xbf16, #tpu.memory_space<vmem>>, vector<1x1x256xbf16>
    %37 = vector.shape_cast %36 : vector<1x1x256xbf16> to vector<1x256xbf16>
    %cst_30 = arith.constant dense<0.000000e+00> : vector<1x32xf32>
    %38 = tpu.matmul %37, %0, %cst_30 {dimension_numbers = #tpu.dot_dimension_numbers<[1], [0], [0], [1], [0, 0, 1, 1], [], []>} : vector<1x256xbf16>, vector<256x32xbf16>, vector<1x32xf32> -> vector<1x32xf32>
    %39 = arith.addf %38, %1 : vector<1x32xf32>
    %cst_31 = arith.constant 0.000000e+00 : f32
    %40 = vector.broadcast %cst_31 : f32 to vector<1x32xf32>
    %41 = arith.maximumf %39, %40 : vector<1x32xf32>
    %42 = arith.truncf %41 : vector<1x32xf32> to vector<1x32xbf16>
    %c3_32 = arith.constant 3 : index
    %c0_33 = arith.constant 0 : index
    %c0_34 = arith.constant 0 : index
    %43 = vector.load %arg4[%c3_32, %c0_33, %c0_34] : memref<4x32x256xbf16, #tpu.memory_space<vmem>>, vector<1x32x256xbf16>
    %44 = vector.shape_cast %43 : vector<1x32x256xbf16> to vector<32x256xbf16>
    %cst_35 = arith.constant dense<0.000000e+00> : vector<1x256xf32>
    %45 = tpu.matmul %42, %44, %cst_35 {dimension_numbers = #tpu.dot_dimension_numbers<[1], [0], [0], [1], [0, 0, 1, 1], [], []>} : vector<1x32xbf16>, vector<32x256xbf16>, vector<1x256xf32> -> vector<1x256xf32>
    %46 = arith.addf %35, %45 : vector<1x256xf32>
    %c0_36 = arith.constant 0 : index
    %c0_37 = arith.constant 0 : index
    %47 = vector.load %arg5[%c0_36, %c0_37] : memref<1x256xf32, #tpu.memory_space<vmem>>, vector<1x256xf32>
    %48 = arith.addf %46, %47 : vector<1x256xf32>
    %cst_38 = arith.constant 0.000000e+00 : f32
    %49 = vector.broadcast %cst_38 : f32 to vector<1x256xf32>
    %50 = arith.maximumf %48, %49 : vector<1x256xf32>
    %51 = arith.truncf %50 : vector<1x256xf32> to vector<1x256xbf16>
    %c0_39 = arith.constant 0 : index
    %c0_40 = arith.constant 0 : index
    %52 = vector.load %arg6[%c0_39, %c0_40] : memref<256x6xbf16, #tpu.memory_space<vmem>>, vector<256x6xbf16>
    %cst_41 = arith.constant dense<0.000000e+00> : vector<1x6xf32>
    %53 = tpu.matmul %51, %52, %cst_41 {dimension_numbers = #tpu.dot_dimension_numbers<[1], [0], [0], [1], [0, 0, 1, 1], [], []>} : vector<1x256xbf16>, vector<256x6xbf16>, vector<1x6xf32> -> vector<1x6xf32>
    %c0_42 = arith.constant 0 : index
    %c0_43 = arith.constant 0 : index
    %54 = vector.load %arg7[%c0_42, %c0_43] : memref<1x6xf32, #tpu.memory_space<vmem>>, vector<1x6xf32>
    %55 = arith.addf %53, %54 : vector<1x6xf32>
    %c0_44 = arith.constant 0 : index
    %c0_45 = arith.constant 0 : index
    %c0_46 = arith.constant 0 : index
    %56 = vector.load %arg8[%c0_44, %c0_45, %c0_46] : memref<1x1x6xf32, #tpu.memory_space<vmem>>, vector<1x1x6xf32>
    %57 = vector.shape_cast %56 : vector<1x1x6xf32> to vector<1x6xf32>
    %58 = vector.shape_cast %55 : vector<1x6xf32> to vector<1x1x6xf32>
    tpu.vector_store %arg8[%c0_44, %c0_45, %c0_46], %58 {strides = array<i32>} : memref<1x1x6xf32, #tpu.memory_space<vmem>>, vector<1x1x6xf32>,
    return
  }
  func.func @transform_0(%arg0: i32) -> (i32, i32, i32) {
    %c0_i32 = arith.constant 0 : i32
    %c0_i32_0 = arith.constant 0 : i32
    %c0_i32_1 = arith.constant 0 : i32
    return %arg0, %c0_i32, %c0_i32_0 : i32, i32, i32
  }
  func.func @transform_1(%arg0: i32) -> (i32, i32) {
    %c0_i32 = arith.constant 0 : i32
    %c0_i32_0 = arith.constant 0 : i32
    %c0_i32_1 = arith.constant 0 : i32
    return %c0_i32, %c0_i32_0 : i32, i32
  }
  func.func @transform_2(%arg0: i32) -> (i32, i32) {
    %c0_i32 = arith.constant 0 : i32
    %c0_i32_0 = arith.constant 0 : i32
    %c0_i32_1 = arith.constant 0 : i32
    return %c0_i32, %c0_i32_0 : i32, i32
  }
  func.func @transform_3(%arg0: i32) -> (i32, i32, i32) {
    %c0_i32 = arith.constant 0 : i32
    %c0_i32_0 = arith.constant 0 : i32
    %c0_i32_1 = arith.constant 0 : i32
    %c0_i32_2 = arith.constant 0 : i32
    return %c0_i32, %c0_i32_0, %c0_i32_1 : i32, i32, i32
  }
  func.func @transform_4(%arg0: i32) -> (i32, i32) {
    %c0_i32 = arith.constant 0 : i32
    %c0_i32_0 = arith.constant 0 : i32
    %c0_i32_1 = arith.constant 0 : i32
    return %c0_i32, %c0_i32_0 : i32, i32
  }
  func.func @transform_5(%arg0: i32) -> (i32, i32) {
    %c0_i32 = arith.constant 0 : i32
    %c0_i32_0 = arith.constant 0 : i32
    %c0_i32_1 = arith.constant 0 : i32
    return %c0_i32, %c0_i32_0 : i32, i32
  }
  func.func @transform_6(%arg0: i32) -> (i32, i32) {
    %c0_i32 = arith.constant 0 : i32
    %c0_i32_0 = arith.constant 0 : i32
    %c0_i32_1 = arith.constant 0 : i32
    return %c0_i32, %c0_i32_0 : i32, i32
  }
  func.func @transform_7(%arg0: i32) -> (i32, i32, i32) {
    %c0_i32 = arith.constant 0 : i32
    %c0_i32_0 = arith.constant 0 : i32
    %c0_i32_1 = arith.constant 0 : i32
    return %arg0, %c0_i32, %c0_i32_0 : i32, i32, i32
  }
}

</mosaic_0001>

<bundles_post_ra>
// kernel: dqn_forward.2
= control target key start
LH: loop header
LB: loop body
LE: loop exit
PB: predicated region body
PF: predicated region fallthrough
CT: control target
= control target key end

     0   :  { %vm384_vm0 = vcmask 125952   ;;  %vm397_vm1 = vcmask 122880   ;;  %s746_s1 = inlined_call_operand.vmem [shape: bf16[256,16], index: 1, kind: input, shape index: {}]   ;;  %s747_s0 = inlined_call_operand.vmem [shape: bf16[98,256], index: 0, kind: input, shape index: {}]   ;;  %s748_s2 = inlined_call_operand.vmem [shape: f32[1,16], index: 2, kind: input, shape index: {}]   ;;  %s749_s3 = inlined_call_operand.vmem [shape: bf16[98,16], index: 3, kind: output, shape index: {}]  }
   0x1   :  { %v534_v0 = vld [vmem:[%s746_s1 + $0x40] sm:$0xff]   ;;  %v536_v2 = vld [vmem:[%s746_s1 + $0x48] sm:$0xff]   ;;  %v538_v4 = vld [vmem:[%s746_s1 + $0x50] sm:$0xff]  }
   0x2   :  { %v535_v1 = vld [vmem:[%s746_s1] sm:$0xff]   ;;  %460 = vmatprep.subr.bf16.mxu0 %v534_v0  ;;  %518 = vmatprep.subr.bf16.mxu1 %v534_v0  ;;  %v537_v3 = vld [vmem:[%s746_s1 + $0x8] sm:$0xff]   ;;  %v539_v5 = vld [vmem:[%s746_s1 + $0x10] sm:$0xff]  }
   0x3   :  { %461 = vmatpush3.bf16.msra.mxu0 %v535_v1  ;;  %526 = vmatpush3.bf16.msra.mxu1 %v535_v1  ;;  %v540_v6 = vld [vmem:[%s746_s1 + $0x58] sm:$0xff]   ;;  %v542_v8 = vld [vmem:[%s746_s1 + $0x60] sm:$0xff]   ;;  %v544_v10 = vld [vmem:[%s746_s1 + $0x68] sm:$0xff]  }
   0x4   :  { %462 = vmatprep.subr.bf16.mxu0 %v536_v2  ;;  %519 = vmatprep.subr.bf16.mxu1 %v536_v2  ;;  %v541_v7 = vld [vmem:[%s746_s1 + $0x18] sm:$0xff]   ;;  %v543_v9 = vld [vmem:[%s746_s1 + $0x20] sm:$0xff]   ;;  %v545_v13 = vld [vmem:[%s746_s1 + $0x28] sm:$0xff]  }
   0x5   :  { %v552_v11 = vld [vmem:[%s747_s0 + $0x4] ss:$8 sps:$4 sm:$0xff]   ;;  %v546_v14 = vld [vmem:[%s746_s1 + $0x70] sm:$0xff]   ;;  %v548_v16 = vld [vmem:[%s746_s1 + $0x78] sm:$0xff]  }
   0x6   :  { %v555_v12 = vld [vmem:[%s747_s0 + $0x44] ss:$8 sps:$4 sm:$0xff]   ;;  %262 = vmatprep.mubr.bf16.mxu0 %v552_v11  ;;  %v547_v15 = vld [vmem:[%s746_s1 + $0x30] sm:$0xff]   ;;  %v549_v17 = vld [vmem:[%s746_s1 + $0x38] sm:$0xff]  }
   0x7   :  { %463 = vmatpush3.bf16.msra.mxu0 %v537_v3  ;;  %527 = vmatpush3.bf16.msra.mxu1 %v537_v3  ;;  %v550_v18 = vld [vmem:[%s747_s0] ss:$8 sps:$4 sm:$0xff]   ;;  %v556_v20 = vld [vmem:[%s747_s0 + $0x14] ss:$8 sps:$4 sm:$0xff]   ;;  %v558_v23 = vld [vmem:[%s747_s0 + $0x10] ss:$8 sps:$4 sm:$0xff]  }
   0x8   :  { %464 = vmatprep.subr.bf16.mxu0 %v538_v4  ;;  %520 = vmatprep.subr.bf16.mxu1 %v538_v4  ;;  %v553_v19 = vld [vmem:[%s747_s0 + $0x40] ss:$8 sps:$4 sm:$0xff]   ;;  %v559_v21 = vld [vmem:[%s747_s0 + $0x54] ss:$8 sps:$4 sm:$0xff]   ;;  %v563_v24 = vld [vmem:[%s747_s0 + $0x50] ss:$8 sps:$4 sm:$0xff]  }
   0x9   :  { %294 = vmatprep.mubr.bf16.mxu1 %v555_v12  ;;  %v27_v22 = vld [vmem:[%s747_s0 + $0x60] sm:$0x11]  ;;  %v566_v29 = vld [vmem:[%s747_s0 + $0x34] ss:$8 sps:$4 sm:$0xff]   ;;  %v569_v30 = vld [vmem:[%s747_s0 + $0x30] ss:$8 sps:$4 sm:$0xff]  }
   0xa   :  { %v561_v25 = vld [vmem:[%s747_s0 + $0x24] ss:$8 sps:$4 sm:$0xff]   ;;  %v417_v26 = vcombine.high %v27_v22, %v27_v22  ;;  %v564_v27 = vld [vmem:[%s747_s0 + $0x20] ss:$8 sps:$4 sm:$0xff]   ;;  %v416_v28 = vcombine.low %v27_v22, %v27_v22 }
   0xb   :  { %465 = vmatpush3.bf16.msra.mxu0 %v539_v5  ;;  %528 = vmatpush3.bf16.msra.mxu1 %v539_v5  ;;  %v680_v33 = vld [vmem:[%s748_s2] ss:$0 sm:$0xff] }
   0xc   :  { %466 = vmatprep.subr.bf16.mxu0 %v540_v6  ;;  %521 = vmatprep.subr.bf16.mxu1 %v540_v6 }
   0xf   :  { %467 = vmatpush3.bf16.msra.mxu0 %v541_v7  ;;  %529 = vmatpush3.bf16.msra.mxu1 %v541_v7 }
  0x10   :  { %468 = vmatprep.subr.bf16.mxu0 %v542_v8  ;;  %522 = vmatprep.subr.bf16.mxu1 %v542_v8 }
  0x13   :  { %469 = vmatpush3.bf16.msra.mxu0 %v543_v9  ;;  %530 = vmatpush3.bf16.msra.mxu1 %v543_v9 }
  0x14   :  { %470 = vmatprep.subr.bf16.mxu0 %v544_v10  ;;  %523 = vmatprep.subr.bf16.mxu1 %v544_v10 }
  0x17   :  { %471 = vmatpush3.bf16.msra.mxu0 %v545_v13  ;;  %531 = vmatpush3.bf16.msra.mxu1 %v545_v13 }
  0x18   :  { %472 = vmatprep.subr.bf16.mxu0 %v546_v14  ;;  %524 = vmatprep.subr.bf16.mxu1 %v546_v14 }
  0x1b   :  { %473 = vmatpush3.bf16.msra.mxu0 %v547_v15  ;;  %532 = vmatpush3.bf16.msra.mxu1 %v547_v15 }
  0x1c   :  { %474 = vmatprep.subr.bf16.mxu0 %v548_v16  ;;  %525 = vmatprep.subr.bf16.mxu1 %v548_v16 }
  0x1f   :  { %475 = vmatpush3.bf16.msra.mxu0 %v549_v17  ;;  %533 = vmatpush3.bf16.msra.mxu1 %v549_v17 }
  0x22   :  { %263 = vmatmul.mubr.bf16.vlgmr.msra.gmra.mrb[0].mxu0 %v550_v18  ;;  %295 = vmatmul.mubr.bf16.vlgmr.msra.gmra.mrb[0].mxu1 %v553_v19 }
  0x23   :  { %270 = vmatprep.mubr.bf16.mxu0 %v556_v20  ;;  %302 = vmatprep.mubr.bf16.mxu1 %v559_v21 }
  0x2a   :  { %271 = vmatmul.mubr.bf16.gmra.mrb[4].mxu0 %v558_v23  ;;  %303 = vmatmul.mubr.bf16.gmra.mrb[4].mxu1 %v563_v24 }
  0x2b   :  { %278 = vmatprep.mubr.bf16.mxu0 %v561_v25  ;;  %310 = vmatprep.mubr.bf16.mxu1 %v417_v26 }
  0x32   :  { %279 = vmatmul.mubr.bf16.gmra.mrb[8].mxu0 %v564_v27  ;;  %311 = vmatmul.mubr.bf16.gmra.mrb[8].mxu1 %v416_v28 }
  0x33   :  { %286 = vmatprep.mubr.bf16.mxu0 %v566_v29 }
  0x3a   :  { %287 = vmatmul.mubr.bf16.gmra.mrb[12].mxu0 %v569_v30 }
  0xf5   :  { %v476_v31 = vpop.f32.mrb[0].mxu0  ;;  %v500_v32 = vpop.f32.mrb[0].mxu1 }
  0xf6   :  { %v477_v34 = vpop.f32.mrb[1].mxu0  ;;  %v501_v35 = vpop.f32.mrb[1].mxu1 }
  0xf7   :  { %v478_v36 = vadd.f32 %v477_v34, %v476_v31  ;;  %v479_v37 = vpop.f32.mrb[2].mxu0  ;;  %v502_v38 = vadd.f32 %v501_v35, %v500_v32  ;;  %v503_v39 = vpop.f32.mrb[2].mxu1 }
  0xf8   :  { %v480_v40 = vpop.f32.mrb[3].mxu0  ;;  %v504_v41 = vpop.f32.mrb[3].mxu1 }
  0xf9   :  { %v265_v42 = vadd.f32 %v478_v36, %v680_v33  ;;  %v481_v43 = vadd.f32 %v480_v40, %v479_v37  ;;  %v297_v44 = vadd.f32 %v502_v38, %v680_v33  ;;  %v505_v45 = vadd.f32 %v504_v41, %v503_v39 }
  0xfb   :  { %v318_v46 = vmax.f32 %v265_v42, 0.0  ;;  %v268_v47 = vadd.f32 %v481_v43, %v680_v33  ;;  %v326_v48 = vmax.f32 %v297_v44, 0.0  ;;  %v300_v49 = vadd.f32 %v505_v45, %v680_v33 }
  0xfd   :  { %v447_v50 = vpack.c.bf16 %v318_v46, %v318_v46  ;;  %v319_v51 = vmax.f32 %v268_v47, 0.0  ;;  %v482_v52 = vpop.f32.mrb[4].mxu0  ;;  %v455_v53 = vpack.c.bf16 %v326_v48, %v326_v48  ;;  %v327_v54 = vmax.f32 %v300_v49, 0.0  ;;  %v506_v55 = vpop.f32.mrb[4].mxu1 }
  0xfe   :  { %v483_v56 = vpop.f32.mrb[5].mxu0  ;;  %v507_v57 = vpop.f32.mrb[5].mxu1 }
  0xff   :  { %385 = vst.msk [vmem:[%s749_s3] sm:$0xf] %vm384_vm0, %v447_v50  ;;  %v448_v58 = vpack.c.bf16 %v319_v51, %v319_v51  ;;  %393 = vst.msk [vmem:[%s749_s3 + $0x20] sm:$0xf] %vm384_vm0, %v455_v53  ;;  %v484_v59 = vadd.f32 %v483_v56, %v482_v52  ;;  %v485_v60 = vpop.f32.mrb[6].mxu0  ;;  %v456_v61 = vpack.c.bf16 %v327_v54, %v327_v54  ;;  %v509_v63 = vpop.f32.mrb[6].mxu1 }
 0x100   :  { %v508_v62 = vadd.f32 %v507_v57, %v506_v55  ;;  %v486_v0 = vpop.f32.mrb[7].mxu0  ;;  %v510_v1 = vpop.f32.mrb[7].mxu1 }
 0x101   :  { %386 = vst.msk [vmem:[%s749_s3 + $0x4] sm:$0xf] %vm384_vm0, %v448_v58  ;;  %v273_v2 = vadd.f32 %v484_v59, %v680_v33  ;;  %394 = vst.msk [vmem:[%s749_s3 + $0x24] sm:$0xf] %vm384_vm0, %v456_v61  ;;  %v487_v3 = vadd.f32 %v486_v0, %v485_v60  ;;  %v511_v5 = vadd.f32 %v510_v1, %v509_v63 }
 0x102   :  { %v305_v4 = vadd.f32 %v508_v62, %v680_v33 }
 0x103   :  { %v320_v6 = vmax.f32 %v273_v2, 0.0  ;;  %v276_v7 = vadd.f32 %v487_v3, %v680_v33  ;;  %v308_v9 = vadd.f32 %v511_v5, %v680_v33 }
 0x104   :  { %v328_v8 = vmax.f32 %v305_v4, 0.0 }
 0x105   :  { %v449_v10 = vpack.c.bf16 %v320_v6, %v320_v6  ;;  %v321_v11 = vmax.f32 %v276_v7, 0.0  ;;  %v488_v12 = vpop.f32.mrb[8].mxu0  ;;  %v329_v14 = vmax.f32 %v308_v9, 0.0  ;;  %v512_v15 = vpop.f32.mrb[8].mxu1 }
 0x106   :  { %v457_v13 = vpack.c.bf16 %v328_v8, %v328_v8  ;;  %v489_v16 = vpop.f32.mrb[9].mxu0  ;;  %v513_v17 = vpop.f32.mrb[9].mxu1 }
 0x107   :  { %387 = vst.msk [vmem:[%s749_s3 + $0x8] sm:$0xf] %vm384_vm0, %v449_v10  ;;  %v450_v18 = vpack.c.bf16 %v321_v11, %v321_v11  ;;  %v490_v19 = vadd.f32 %v489_v16, %v488_v12  ;;  %v491_v20 = vpop.f32.mrb[10].mxu0  ;;  %v458_v21 = vpack.c.bf16 %v329_v14, %v329_v14  ;;  %v514_v22 = vadd.f32 %v513_v17, %v512_v15  ;;  %v515_v23 = vpop.f32.mrb[10].mxu1 }
 0x108   :  { %395 = vst.msk [vmem:[%s749_s3 + $0x28] sm:$0xf] %vm384_vm0, %v457_v13  ;;  %v492_v24 = vpop.f32.mrb[11].mxu0  ;;  %v516_v25 = vpop.f32.mrb[11].mxu1 }
 0x109   :  { %388 = vst.msk [vmem:[%s749_s3 + $0xc] sm:$0xf] %vm384_vm0, %v450_v18  ;;  %v281_v26 = vadd.f32 %v490_v19, %v680_v33  ;;  %396 = vst.msk [vmem:[%s749_s3 + $0x2c] sm:$0xf] %vm384_vm0, %v458_v21  ;;  %v493_v27 = vadd.f32 %v492_v24, %v491_v20  ;;  %v313_v28 = vadd.f32 %v514_v22, %v680_v33 }
 0x10b   :  { %v322_v29 = vmax.f32 %v281_v26, 0.0  ;;  %v284_v30 = vadd.f32 %v493_v27, %v680_v33  ;;  %v330_v31 = vmax.f32 %v313_v28, 0.0 }
 0x10d   :  { %v451_v32 = vpack.c.bf16 %v322_v29, %v322_v29  ;;  %v323_v34 = vmax.f32 %v284_v30, 0.0  ;;  %v494_v35 = vpop.f32.mrb[12].mxu0  ;;  %v459_v36 = vpack.c.bf16 %v330_v31, %v330_v31 }
 0x10e   :  { %v495_v37 = vpop.f32.mrb[13].mxu0 }
 0x10f   :  { %389 = vst.msk [vmem:[%s749_s3 + $0x10] sm:$0xf] %vm384_vm0, %v451_v32  ;;  %v452_v38 = vpack.c.bf16 %v323_v34, %v323_v34  ;;  %v496_v39 = vadd.f32 %v495_v37, %v494_v35  ;;  %v497_v40 = vpop.f32.mrb[14].mxu0 }
 0x110   :  { %398 = vst.msk [vmem:[%s749_s3 + $0x30] sm:$0x1] %vm397_vm1, %v459_v36  ;;  %v498_v41 = vpop.f32.mrb[15].mxu0 }
 0x111   :  { %390 = vst.msk [vmem:[%s749_s3 + $0x14] sm:$0xf] %vm384_vm0, %v452_v38  ;;  %v289_v42 = vadd.f32 %v496_v39, %v680_v33  ;;  %v499_v43 = vadd.f32 %v498_v41, %v497_v40 }
 0x113   :  { %v324_v44 = vmax.f32 %v289_v42, 0.0  ;;  %v292_v45 = vadd.f32 %v499_v43, %v680_v33 }
 0x115   :  { %v453_v46 = vpack.c.bf16 %v324_v44, %v324_v44  ;;  %v325_v47 = vmax.f32 %v292_v45, 0.0 }
 0x117   :  { %391 = vst.msk [vmem:[%s749_s3 + $0x18] sm:$0xf] %vm384_vm0, %v453_v46  ;;  %v454_v48 = vpack.c.bf16 %v325_v47, %v325_v47 }
 0x119   :  { %392 = vst.msk [vmem:[%s749_s3 + $0x1c] sm:$0xf] %vm384_vm0, %v454_v48 }

// kernel: dqn_forward.3
= control target key start
LH: loop header
LB: loop body
LE: loop exit
PB: predicated region body
PF: predicated region fallthrough
CT: control target
= control target key end

     0   :  { %12 = vsyncpa [#allocation3], 0  ;;  %s1938_s0 = inlined_call_operand.vmem [shape: bf16[2,4,256], index: 0, kind: input, shape index: {}]   ;;  %s1939_s1 = inlined_call_operand.vmem [shape: bf16[256,32], index: 1, kind: input, shape index: {}]   ;;  %s1940_s2 = inlined_call_operand.vmem [shape: f32[1,32], index: 2, kind: input, shape index: {}]   ;;  %s1941_s3 = inlined_call_operand.vmem [shape: bf16[4,32,256], index: 3, kind: input, shape index: {}]   ;;  %s1942_s4 = inlined_call_operand.vmem [shape: f32[1,256], index: 4, kind: input, shape index: {}]   ;;  %s1943_s5 = inlined_call_operand.vmem [shape: bf16[256,6], index: 5, kind: input, shape index: {}]   ;;  %s1944_s6 = inlined_call_operand.vmem [shape: f32[1,6], index: 6, kind: input, shape index: {}]   ;;  %s1945_s7 = inlined_call_operand.hbm [shape: f32[2,1,6], index: 7, kind: output, shape index: {}]  }
   0x1   :  { %14 = vsyncpa [#allocation3 + $0x1], 0  ;;  %s1565_s24 = smov 0   ;;  %s1567_s25 = smov 0  }
   0x2   :  { %s1569_s26 = smov 0   ;;  %s1571_s27 = smov 0  }
   0x3 LB: > { %s1586_s28 = sadd.s32 4294967295, %s1521_s27   ;;  %s1175_s29 = sadd.s32 4294967294, %s1521_s27   ;;  %s1521_s27 = sphi %s1571_s27, %s1951_s27   ;;  %s1517_s26 = sphi %s1569_s26, %s1950_s26   ;;  %s1513_s25 = sphi %s1567_s25, %s1949_s25   ;;  %s1509_s24 = sphi %s1565_s24, %s1948_s24  }
   0x4   : > { %s1590_s30 = sadd.s32 1, %s1521_s27   ;;  %s179_s8 = sadd.s32 1, %s1517_s26 }
   0x5   : > { %s176_s9 = ssub.s32 %s1521_s27, %s1590_s30  ;;  %p189_p0 = scmp.ne.s32.totalorder %s1517_s26, %s1513_s25 }
   0x6   : > { %p177_p1 = scmp.eq.s32.totalorder %s176_s9, 0  ;;  %p190_p2 = scmp.eq.s32.totalorder %s1586_s28, 1 }
   0x7   : > { %p195_p3 = scmp.ne.s32.totalorder %s1513_s25, %s1509_s24  ;;  %p196_p4 = scmp.eq.s32.totalorder %s1175_s29, 1 }
   0x8   : > { %s1601_s10 = scalar_select %p177_p1, %s1517_s26, %s179_s8  }
   0x9   : > { %p1603_p5 = por %p190_p2, %p189_p0  ;;  %p1607_p6 = por %p196_p4, %p195_p3 }
   0xa   : > { %p1178_p7 = scmp.ge.s32.totalorder %s1521_s27, 1  ;;  %p240_p8 = scmp.lt.s32.totalorder %s1521_s27, 3 }
   0xc   : > { %p241_p9 = pnand %p1178_p7, %p240_p8 }
   0xd   : > { %v1616_v0 = vld [vmem:[%s1939_s1 + $0x40] sm:$0xff] (!%p241_p9)   ;;  %v1628_v2 = vld [vmem:[%s1939_s1 + $0x48] sm:$0xff] (!%p241_p9)   ;;  %p271_p10 = scmp.lt.s32.totalorder (!%p241_p9), %s1586_s28, 1  ;;  %v1643_v4 = vld [vmem:[%s1939_s1 + $0x50] sm:$0xff] (!%p241_p9)   ;;  %v1523_v29 = vmov (!%p241_p9), 0   ;;  %vm549_vm0 = vcmask (!%p241_p9), 261120  }
   0xe   : > { %244 = sbr.rel (%p241_p9) target bundleno = 1005 (0x3ed), region = 48  ;;  %v1621_v1 = vld [vmem:[%s1939_s1] sm:$0xff] (!%p241_p9)   ;;  %1253 = vmatprep.subr.bf16.mxu0 (!%p241_p9), %v1616_v0  ;;  %1275 = vmatprep.subr.bf16.mxu1 (!%p241_p9), %v1616_v0  ;;  %v1636_v3 = vld [vmem:[%s1939_s1 + $0x8] sm:$0xff] (!%p241_p9)   ;;  %v1651_v5 = vld [vmem:[%s1939_s1 + $0x10] sm:$0xff] (!%p241_p9)   ;;  %s269_s20 = sand.u32 (!%p241_p9), 1, %s1513_s25   ;;  %vm1105_vm1 = vcmask (!%p241_p9), 40960  }
   0xf   : > { %1254 = vmatpush3.bf16.msra.mxu0 (!%p241_p9), %v1621_v1  ;;  %1276 = vmatpush3.bf16.msra.mxu1 (!%p241_p9), %v1621_v1  ;;  %v1658_v6 = vld [vmem:[%s1939_s1 + $0x58] sm:$0xff] (!%p241_p9)   ;;  %v1672_v8 = vld [vmem:[%s1939_s1 + $0x60] sm:$0xff] (!%p241_p9)   ;;  %v1687_v10 = vld [vmem:[%s1939_s1 + $0x68] sm:$0xff] (!%p241_p9)   ;;  %s270_s29 = scalar_lea.vmem (!%p241_p9), [#allocation2], %s269_s20  ;;  %s1108_s15 = scalar_lea.sflag (!%p241_p9), [#allocation3], %s269_s20 }
  0x10   : > { %1255 = vmatprep.subr.bf16.mxu0 (!%p241_p9), %v1628_v2  ;;  %1277 = vmatprep.subr.bf16.mxu1 (!%p241_p9), %v1628_v2  ;;  %v1665_v7 = vld [vmem:[%s1939_s1 + $0x18] sm:$0xff] (!%p241_p9)   ;;  %v1680_v9 = vld [vmem:[%s1939_s1 + $0x20] sm:$0xff] (!%p241_p9)   ;;  %v1694_v12 = vld [vmem:[%s1939_s1 + $0x28] sm:$0xff] (!%p241_p9)   ;;  %s1120_s8 = sshll.u32 (!%p241_p9), %s270_s29, 4  ;;  %s1524_s16 = smov (!%p241_p9), [#allocation2]   ;;  %s1898_s8 = int_to_ptr.vmem [resolvable:$true] %s1120_s8 }
  0x11   : > { %v1701_v15 = vld [vmem:[%s1939_s1 + $0x70] sm:$0xff] (!%p241_p9)   ;;  %v1719_v20 = vld [vmem:[%s1939_s1 + $0x78] sm:$0xff] (!%p241_p9)   ;;  %v1421_v24 = vld [vmem:[%s1941_s3 + $0x24] ss:$8 sps:$4 sm:$0xff] (!%p241_p9)   ;;  %s1463_s17 = sshll.u32 (!%p241_p9), %s1524_s16, 4  ;;  %s1464_s17 = int_to_ptr.vmem [resolvable:$false] %s1463_s17 }
  0x12   : > { %v1714_v18 = vld [vmem:[%s1939_s1 + $0x30] sm:$0xff] (!%p241_p9)   ;;  %v1729_v22 = vld [vmem:[%s1939_s1 + $0x38] sm:$0xff] (!%p241_p9)   ;;  %v1419_v25 = vld [vmem:[%s1941_s3 + $0x20] ss:$8 sps:$4 sm:$0xff] (!%p241_p9)   ;;  %s1465_s18 = scalar_lea.vmem (!%p241_p9), %s1464_s17, 32  ;;  %p1466_p0 = scmp.lt.s32.totalorder (!%p241_p9), %s1898_s8, %s1464_s17 }
  0x13   : > { %1256 = vmatpush3.bf16.msra.mxu0 (!%p241_p9), %v1636_v3  ;;  %1278 = vmatpush3.bf16.msra.mxu1 (!%p241_p9), %v1636_v3  ;;  %v1424_v26 = vld [vmem:[%s1941_s3 + $0x34] ss:$8 sps:$4 sm:$0xff] (!%p241_p9)   ;;  %v1422_v27 = vld [vmem:[%s1941_s3 + $0x30] ss:$8 sps:$4 sm:$0xff] (!%p241_p9)   ;;  %v1427_v28 = vld [vmem:[%s1941_s3 + $0x4] ss:$8 sps:$4 sm:$0xff] (!%p241_p9)  }
  0x14   : > { %1257 = vmatprep.subr.bf16.mxu0 (!%p241_p9), %v1643_v4  ;;  %1279 = vmatprep.subr.bf16.mxu1 (!%p241_p9), %v1643_v4  ;;  %v1773_v32 = vld [vmem:[%s1940_s2] sm:$0x1] (!%p241_p9)  ;;  %v1430_v46 = vld [vmem:[%s1941_s3 + $0x14] ss:$8 sps:$4 sm:$0xff] (!%p241_p9)   ;;  %v1428_v47 = vld [vmem:[%s1941_s3 + $0x10] ss:$8 sps:$4 sm:$0xff] (!%p241_p9)  }
  0x15   : > { %s272_s23 = scalar_select %p271_p10, %s1586_s28, 1  ;;  %v1425_v43 = vld [vmem:[%s1941_s3] ss:$8 sps:$4 sm:$0xff]   ;;  %v1433_v49 = vld [vmem:[%s1941_s3 + $0x44] ss:$8 sps:$4 sm:$0xff]  }
  0x16   : > { %v1431_v50 = vld [vmem:[%s1941_s3 + $0x40] ss:$8 sps:$4 sm:$0xff]   ;;  %v1436_v52 = vld [vmem:[%s1941_s3 + $0x54] ss:$8 sps:$4 sm:$0xff]   ;;  %v1434_v53 = vld [vmem:[%s1941_s3 + $0x50] ss:$8 sps:$4 sm:$0xff]  }
  0x17   : > { %s1252_s14 = sshll.u32 %s272_s23, 2  ;;  %1258 = vmatpush3.bf16.msra.mxu0 %v1651_v5  ;;  %1280 = vmatpush3.bf16.msra.mxu1 %v1651_v5  ;;  %s1249_s23 = sshll.u32 %s1586_s28, 4 }
  0x18   : > { %1259 = vmatprep.subr.bf16.mxu0 %v1658_v6  ;;  %1281 = vmatprep.subr.bf16.mxu1 %v1658_v6  ;;  %s275_s21 = scalar_lea.vmem %s1938_s0, %s1252_s14  ;;  %s1896_s14 = scalar_lea.hbm %s1945_s7, %s1249_s23 }
  0x19   : > { %v1181_v11 = vld.sshfl [vmem:[%s275_s21] sm:$0x11 pattern:$0x76325410]  ;;  %s1459_s28 = scalar_lea.vmem %s1898_s8, 16 }
  0x1a   : > { %v319_v13 = vcombine.high %v1181_v11, %v1181_v11  ;;  %v1696_v14 = vld.sshfl [vmem:[%s275_s21] sm:$0x22 pattern:$0x76325410]  ;;  %v475_v19 = vshrl.u32 %v1181_v11, 16  ;;  %p1460_p11 = scmp.ne.s32.totalorder %s1898_s8, %s1459_s28  ;;  %p1467_p1 = scmp.lt.s32.totalorder %s1465_s18, %s1459_s28 }
  0x1b   : > { %1260 = vmatpush3.bf16.msra.mxu0 %v1665_v7  ;;  %1282 = vmatpush3.bf16.msra.mxu1 %v1665_v7  ;;  %v1705_v16 = vcombine.high %v1696_v14, %v1696_v14  ;;  %v668_v23 = vrot.slane %v1696_v14, 1 }
  0x1c   : > { %1261 = vmatprep.subr.bf16.mxu0 %v1672_v8  ;;  %1283 = vmatprep.subr.bf16.mxu1 %v1672_v8  ;;  %v478_v17 = vshrl.u32 %v319_v13, 16  ;;  %p1461_p12 = pnand %p1460_p11, %p1603_p5  ;;  %p1468_p2 = por %p1467_p1, %p1466_p0 }
  0x1d   : > { %450 = vmatprep.mubr.bf16.mxu0 %v319_v13  ;;  %v669_v21 = vrot.slane %v1705_v16, 1  ;;  %v800_v59 = vshrl.u32 %v1705_v16, 16  ;;  %v1450_v13 = vld [vmem:[%s1943_s5 + $0x18] sm:$0xff]   ;;  %v1453_v16 = vld [vmem:[%s1943_s5 + $0x68] sm:$0xff]  }
  0x1e   : > { %514 = vmatprep.mubr.bf16.mxu1 %v478_v17  ;;  %p1462_p13 = pneg %p1461_p12 }
  0x1f   : > { %1262 = vmatpush3.bf16.msra.mxu0 %v1680_v9  ;;  %1284 = vmatpush3.bf16.msra.mxu1 %v1680_v9  ;;  %v802_v62 = vrot.slane %v800_v59, 1 }
  0x20   : > { %1263 = vmatprep.subr.bf16.mxu0 %v1687_v10  ;;  %1285 = vmatprep.subr.bf16.mxu1 %v1687_v10  ;;  %p1469_p3 = pnand %p1468_p2, %p1462_p13 }
  0x23   : > { %1264 = vmatpush3.bf16.msra.mxu0 %v1694_v12  ;;  %1286 = vmatpush3.bf16.msra.mxu1 %v1694_v12 }
  0x24   : > { %1265 = vmatprep.subr.bf16.mxu0 %v1701_v15  ;;  %1287 = vmatprep.subr.bf16.mxu1 %v1701_v15 }
  0x27   : > { %1266 = vmatpush3.bf16.msra.mxu0 %v1714_v18  ;;  %1288 = vmatpush3.bf16.msra.mxu1 %v1714_v18 }
  0x28   : > { %1267 = vmatprep.subr.bf16.mxu0 %v1719_v20  ;;  %1289 = vmatprep.subr.bf16.mxu1 %v1719_v20 }
  0x2b   : > { %1268 = vmatpush3.bf16.msra.mxu0 %v1729_v22  ;;  %1290 = vmatpush3.bf16.msra.mxu1 %v1729_v22 }
  0x2c   : > { %1297 = vmatprep.subr.bf16.mxu0 %v1616_v0  ;;  %553 = vmatprep.subr.bf16.mxu1 %v1421_v24 }
  0x2e   : > { %451 = vmatmul.mubr.bf16.vlgmr.msra.gmra.mrb[0].mxu0 %v1181_v11  ;;  %515 = vmatmul.mubr.bf16.vlgmr.msra.gmra.mrb[0].mxu1 %v475_v19  ;;  %v1448_v11 = vld [vmem:[%s1943_s5 + $0x10] sm:$0xff]  }
  0x2f   : > { %1298 = vmatpush3.bf16.msra.mxu0 %v1621_v1  ;;  %704 = vmatprep.mubr.bf16.mxu0 %v669_v21 }
  0x30   : > { %1299 = vmatprep.subr.bf16.mxu0 %v1628_v2  ;;  %554 = vmatpush1.bf16.msra.mxu1 %v1419_v25 }
  0x31   : > { %555 = vmatprep.subr.bf16.mxu1 %v1424_v26  ;;  %585 = vmatprep.mubr.bf16.mxu1 %v1523_v29 }
  0x33   : > { %1300 = vmatpush3.bf16.msra.mxu0 %v1636_v3 }
  0x34   : > { %1301 = vmatprep.subr.bf16.mxu0 %v1643_v4  ;;  %556 = vmatpush1.bf16.msra.mxu1 %v1422_v27 }
  0x35   : > { %617 = vmatprep.subr.bf16.mxu1 %v1427_v28 }
  0x37   : > { %1302 = vmatpush3.bf16.msra.mxu0 %v1651_v5 }
  0x38   : > { %1303 = vmatprep.subr.bf16.mxu0 %v1658_v6 }
  0x3b   : > { %1304 = vmatpush3.bf16.msra.mxu0 %v1665_v7 }
  0x3c   : > { %1305 = vmatprep.subr.bf16.mxu0 %v1672_v8 }
  0x3f   : > { %1306 = vmatpush3.bf16.msra.mxu0 %v1680_v9 }
  0x40   : > { %1307 = vmatprep.subr.bf16.mxu0 %v1687_v10 }
  0x43   : > { %1308 = vmatpush3.bf16.msra.mxu0 %v1694_v12 }
  0x44   : > { %1309 = vmatprep.subr.bf16.mxu0 %v1701_v15 }
  0x47   : > { %1310 = vmatpush3.bf16.msra.mxu0 %v1714_v18 }
  0x48   : > { %1311 = vmatprep.subr.bf16.mxu0 %v1719_v20 }
  0x4b   : > { %1312 = vmatpush3.bf16.msra.mxu0 %v1729_v22 }
  0x4e   : > { %705 = vmatmul.mubr.bf16.vlgmr.msra.gmra.mrb[4].mxu0 %v668_v23 }
 0x101   : > { %v1269_v30 = vpop.f32.mrb[0].mxu0  ;;  %v1291_v31 = vpop.f32.mrb[0].mxu1 }
 0x102   : > { %v1270_v33 = vpop.f32.mrb[1].mxu0  ;;  %v1292_v34 = vpop.f32.mrb[1].mxu1 }
 0x103   : > { %v1271_v35 = vadd.f32 %v1270_v33, %v1269_v30  ;;  %v1293_v36 = vadd.f32 %v1292_v34, %v1291_v31  ;;  %v1272_v37 = vpop.f32.mrb[2].mxu0  ;;  %v1294_v38 = vpop.f32.mrb[2].mxu1 }
 0x104   : > { %v1273_v39 = vpop.f32.mrb[3].mxu0  ;;  %v1295_v40 = vpop.f32.mrb[3].mxu1 }
 0x105   : > { %v517_v41 = vadd.f32 %v1293_v36, %v1773_v32  ;;  %v453_v44 = vadd.f32 %v1271_v35, %v1773_v32 }
 0x107   : > { %v522_v42 = vmax.f32 %v517_v41, 0.0  ;;  %v458_v48 = vmax.f32 %v453_v44, 0.0  ;;  %v1456_v44 = vld [vmem:[%s1943_s5 + $0x30] sm:$0xff]  }
 0x109   : > { %v523_v45 = vpack.c.bf16 %v522_v42, %v522_v42  ;;  %v459_v51 = vpack.c.bf16 %v458_v48, %v458_v48  ;;  %v1454_v42 = vld [vmem:[%s1943_s5 + $0x28] sm:$0xff]  }
 0x10b   : > { %1207 = vmatmul.mubr.msk.bf16.vlgmr.msra.gmra.mrb[4].mxu1 %vm549_vm0, %v523_v45  ;;  %v1458_v45 = vld [vmem:[%s1943_s5 + $0x38] sm:$0xff]  }
 0x10c   : > { %618 = vmatpush1.bf16.msra.mxu1 %v1425_v43  ;;  %649 = vmatprep.mubr.bf16.mxu1 %v1523_v29  ;;  %v1455_v43 = vld [vmem:[%s1943_s5 + $0x70] sm:$0xff]  }
 0x10d   : > { %619 = vmatprep.subr.bf16.mxu1 %v1430_v46  ;;  %v920_v46 = vlaneseq }
 0x110   : > { %620 = vmatpush1.bf16.msra.mxu1 %v1428_v47  ;;  %v921_v47 = vshrl.u32 %v920_v46, 7 }
 0x111   : > { %742 = vmatprep.subr.bf16.mxu1 %v1433_v49  ;;  %v918_v49 = vld [vmem:[%s1942_s4] sm:$0x3] }
 0x112   : > { %v922_v48 = vsub.s32 0, %v921_v47 }
 0x113   : > { %1212 = vmatmul.mubr.msk.bf16.vlgmr.msra.gmra.mrb[8].mxu1 %vm549_vm0, %v459_v51 }
 0x114   : > { %743 = vmatpush1.bf16.msra.mxu1 %v1431_v50  ;;  %774 = vmatprep.mubr.bf16.mxu1 %v1523_v29  ;;  %v926_v50 = vsub.s32 1, %v921_v47  ;;  %v923_v51 = vrot.slane %v918_v49, %v922_v48 }
 0x115   : > { %744 = vmatprep.subr.bf16.mxu1 %v1436_v52 }
 0x118   : > { %745 = vmatpush1.bf16.msra.mxu1 %v1434_v53  ;;  %v927_v53 = vrot.slane %v918_v49, %v926_v50 }
 0x119   : > { %1319 = vmatprep.subr.bf16.mxu1 %v1616_v0  ;;  %v796_v0 = vshrl.u32 %v1696_v14, 16  ;;  %v1451_v14 = vld [vmem:[%s1943_s5 + $0x60] sm:$0xff]  }
 0x121   : > { %v1313_v54 = vpop.f32.mrb[4].mxu0 }
 0x122   : > { %v1314_v55 = vpop.f32.mrb[5].mxu0 }
 0x123   : > { %v1315_v56 = vadd.f32 %v1314_v55, %v1313_v54  ;;  %v1316_v57 = vpop.f32.mrb[6].mxu0 }
 0x124   : > { %v1317_v58 = vpop.f32.mrb[7].mxu0 }
 0x125   : > { %v707_v60 = vadd.f32 %v1315_v56, %v1773_v32 }
 0x127   : > { %v712_v61 = vmax.f32 %v707_v60, 0.0 }
 0x129   : > { %v713_v63 = vpack.c.bf16 %v712_v61, %v712_v61 }
 0x12b   : > { %1222 = vmatmul.mubr.msk.bf16.vlgmr.msra.gmra.mrb[12].mxu1 %vm549_vm0, %v713_v63 }
 0x12c   : > { %1320 = vmatpush3.bf16.msra.mxu1 %v1621_v1  ;;  %837 = vmatprep.mubr.bf16.mxu1 %v802_v62  ;;  %v798_v1 = vrot.slane %v796_v0, 1 }
 0x12d   : > { %1321 = vmatprep.subr.bf16.mxu1 %v1628_v2  ;;  %v1439_v2 = vld [vmem:[%s1941_s3 + $0x64] ss:$8 sps:$4 sm:$0xff]  }
 0x130   : > { %1322 = vmatpush3.bf16.msra.mxu1 %v1636_v3  ;;  %v1437_v3 = vld [vmem:[%s1941_s3 + $0x60] ss:$8 sps:$4 sm:$0xff]  }
 0x131   : > { %1323 = vmatprep.subr.bf16.mxu1 %v1643_v4  ;;  %v1442_v4 = vld [vmem:[%s1941_s3 + $0x74] ss:$8 sps:$4 sm:$0xff]  }
 0x134   : > { %1324 = vmatpush3.bf16.msra.mxu1 %v1651_v5  ;;  %v1440_v5 = vld [vmem:[%s1941_s3 + $0x70] ss:$8 sps:$4 sm:$0xff]  }
 0x135   : > { %1325 = vmatprep.subr.bf16.mxu1 %v1658_v6  ;;  %v1443_v6 = vld [vmem:[%s1943_s5 + $0x40] sm:$0xff]  }
 0x136   : > { %1341 = vmatprep.subr.bf16.mxu0 %v1443_v6 }
 0x138   : > { %1326 = vmatpush3.bf16.msra.mxu1 %v1665_v7  ;;  %v1444_v7 = vld [vmem:[%s1943_s5] sm:$0xff]  }
 0x139   : > { %1327 = vmatprep.subr.bf16.mxu1 %v1672_v8  ;;  %v1445_v8 = vld [vmem:[%s1943_s5 + $0x48] sm:$0xff]   ;;  %1342 = vmatpush3.bf16.msra.mxu0 %v1444_v7 }
 0x13a   : > { %1343 = vmatprep.subr.bf16.mxu0 %v1445_v8 }
 0x13c   : > { %1328 = vmatpush3.bf16.msra.mxu1 %v1680_v9  ;;  %v1446_v9 = vld [vmem:[%s1943_s5 + $0x8] sm:$0xff]  }
 0x13d   : > { %1329 = vmatprep.subr.bf16.mxu1 %v1687_v10  ;;  %v1447_v10 = vld [vmem:[%s1943_s5 + $0x50] sm:$0xff]   ;;  %1344 = vmatpush3.bf16.msra.mxu0 %v1446_v9 }
 0x13e   : > { %1345 = vmatprep.subr.bf16.mxu0 %v1447_v10 }
 0x140   : > { %1330 = vmatpush3.bf16.msra.mxu1 %v1694_v12  ;;  %v1449_v12 = vld [vmem:[%s1943_s5 + $0x58] sm:$0xff]  }
 0x141   : > { %1331 = vmatprep.subr.bf16.mxu1 %v1701_v15  ;;  %1346 = vmatpush3.bf16.msra.mxu0 %v1448_v11  ;;  %v1452_v15 = vld [vmem:[%s1943_s5 + $0x20] sm:$0xff]  }
 0x142   : > { %1347 = vmatprep.subr.bf16.mxu0 %v1449_v12 }
 0x144   : > { %1332 = vmatpush3.bf16.msra.mxu1 %v1714_v18 }
 0x145   : > { %1333 = vmatprep.subr.bf16.mxu1 %v1719_v20  ;;  %1348 = vmatpush3.bf16.msra.mxu0 %v1450_v13 }
 0x146   : > { %1349 = vmatprep.subr.bf16.mxu0 %v1451_v14 }
 0x148   : > { %1334 = vmatpush3.bf16.msra.mxu1 %v1729_v22 }
 0x149   : > { %875 = vmatprep.subr.bf16.mxu1 %v1439_v2  ;;  %1350 = vmatpush3.bf16.msra.mxu0 %v1452_v15  ;;  %v968_v2 = vld [vmem:[%s1944_s6] sm:$0x1] }
 0x14a   : > { %1351 = vmatprep.subr.bf16.mxu0 %v1453_v16 }
 0x14b   : > { %838 = vmatmul.mubr.bf16.vlgmr.msra.gmra.mrb[16].mxu1 %v798_v1 }
 0x14c   : > { %907 = vmatprep.mubr.bf16.mxu1 %v1523_v29  ;;  %876 = vmatpush1.bf16.msra.mxu1 %v1437_v3 }
 0x14d   : > { %877 = vmatprep.subr.bf16.mxu1 %v1442_v4  ;;  %1352 = vmatpush3.bf16.msra.mxu0 %v1454_v42 }
 0x14e   : > { %1353 = vmatprep.subr.bf16.mxu0 %v1455_v43 }
 0x150   : > { %878 = vmatpush1.bf16.msra.mxu1 %v1440_v5 }
 0x151   : > { %1354 = vmatpush3.bf16.msra.mxu0 %v1456_v44 }
 0x1de   : > { %v587_v17 = vpop.f32.mrb[4].mxu1 }
 0x1df   : > { %v589_v18 = vpop.f32.mrb[5].mxu1 }
 0x1e0   : > { %v591_v19 = vpop.f32.mrb[6].mxu1 }
 0x1e1   : > { %v592_v20 = vpop.f32.mrb[7].mxu1 }
 0x1e6   : > { %v651_v21 = vpop.f32.mrb[8].mxu1 }
 0x1e7   : > { %v652_v22 = vadd.f32 %v651_v21, %v587_v17  ;;  %v653_v23 = vpop.f32.mrb[9].mxu1 }
 0x1e8   : > { %v654_v24 = vadd.f32 %v653_v23, %v589_v18  ;;  %v655_v25 = vpop.f32.mrb[10].mxu1 }
 0x1e9   : > { %v656_v26 = vpop.f32.mrb[11].mxu1 }
 0x1fe   : > { %v776_v27 = vpop.f32.mrb[12].mxu1 }
 0x1ff   : > { %v783_v28 = vadd.f32 %v776_v27, %v652_v22  ;;  %v778_v29 = vpop.f32.mrb[13].mxu1 }
 0x200   : > { %v784_v30 = vadd.f32 %v778_v29, %v654_v24  ;;  %v780_v31 = vpop.f32.mrb[14].mxu1 }
 0x201   : > { %v781_v33 = vpop.f32.mrb[15].mxu1 }
 0x21e   : > { %v1335_v34 = vpop.f32.mrb[16].mxu1 }
 0x21f   : > { %v1336_v35 = vpop.f32.mrb[17].mxu1 }
 0x220   : > { %v1337_v36 = vadd.f32 %v1336_v35, %v1335_v34  ;;  %v1338_v37 = vpop.f32.mrb[18].mxu1 }
 0x221   : > { %v1339_v38 = vpop.f32.mrb[19].mxu1 }
 0x222   : > { %v840_v39 = vadd.f32 %v1337_v36, %v1773_v32  ;;  %v1457_v32 = vld [vmem:[%s1943_s5 + $0x78] sm:$0xff]  }
 0x223   : > { %1355 = vmatprep.subr.bf16.mxu0 %v1457_v32 }
 0x224   : > { %v845_v40 = vmax.f32 %v840_v39, 0.0  ;;  %1356 = vmatpush3.bf16.msra.mxu0 %v1458_v45 }
 0x226   : > { %v846_v41 = vpack.c.bf16 %v845_v40, %v845_v40 }
 0x228   : > { %1232 = vmatmul.mubr.msk.bf16.vlgmr.msra.gmra.mrb[20].mxu1 %vm549_vm0, %v846_v41 }
 0x2fb   : > { %v909_v52 = vpop.f32.mrb[20].mxu1 }
 0x2fc   : > { %v916_v54 = vadd.f32 %v909_v52, %v783_v28  ;;  %v911_v55 = vpop.f32.mrb[21].mxu1 }
 0x2fd   : > { %v917_v56 = vadd.f32 %v911_v55, %v784_v30  ;;  %v913_v57 = vpop.f32.mrb[22].mxu1 }
 0x2fe   : > { %v930_v58 = vadd.f32 %v923_v51, %v916_v54  ;;  %v914_v59 = vpop.f32.mrb[23].mxu1 }
 0x2ff   : > { %v931_v60 = vadd.f32 %v927_v53, %v917_v56 }
 0x300   : > { %v932_v61 = vmax.f32 %v930_v58, 0.0 }
 0x301   : > { %v933_v62 = vmax.f32 %v931_v60, 0.0 }
 0x302   : > { %v934_v0 = vpack.c.bf16 %v932_v61, %v932_v61 }
 0x303   : > { %v935_v63 = vpack.c.bf16 %v933_v62, %v933_v62 }
 0x305   : > { %1097 = vmatprep.mubr.bf16.mxu0 %v935_v63 }
 0x306   : > { %1098 = vmatmul.mubr.bf16.vlgmr.msra.gmra.mrb[8].mxu0 %v934_v0 }
 0x3d9   : > { %v1357_v1 = vpop.f32.mrb[8].mxu0 }
 0x3da   : > { %v1358_v3 = vpop.f32.mrb[9].mxu0 }
 0x3db   : > { %v1359_v4 = vadd.f32 %v1358_v3, %v1357_v1  ;;  %v1360_v5 = vpop.f32.mrb[10].mxu0 }
 0x3dc   : > { %v1361_v6 = vpop.f32.mrb[11].mxu0 }
 0x3dd   : > { %v1100_v7 = vadd.f32 %v1359_v4, %v968_v2 }
 0x3df   : > { %1106 = vst.msk [vmem:[%s270_s29] sm:$0x1] %vm1105_vm1, %v1100_v7 }
 0x3e0   : > { %1472 = shalt.err (!%p1469_p3)
}
 0x3e1   : > { %s1473_s19 = scalar_lea.hbm %s1896_s14, 16  ;;  %s1477_s22 = scalar_lea.hbm %s1945_s7, 32 }
 0x3e2   : > { %p1474_p4 = scmp.ne.s32.totalorder %s1896_s14, %s1473_s19  ;;  %p1478_p9 = scmp.lt.u32.totalorder %s1896_s14, %s1945_s7 }
 0x3e3   : > { %p1479_p10 = scmp.lt.u32.totalorder %s1477_s22, %s1473_s19  ;;  %p1481_p12 = scmp.lt.u32.totalorder %s1473_s19, %s1896_s14 }
 0x3e4   : > { %p1475_p7 = pnand %p1474_p4, %p1603_p5 }
 0x3e5   : > { %p1480_p11 = por %p1479_p10, %p1478_p9 }
 0x3e6   : > { %p1476_p8 = pneg %p1475_p7 }
 0x3e7   : > { %p1482_p13 = por %p1481_p12, %p1480_p11 }
 0x3e9   : > { %p1483_p0 = pnand %p1482_p13, %p1476_p8 }
 0x3eb   : > { %1486 = shalt.err (!%p1483_p0)
}
 0x3ec   : > { %1363 = dma.vmem_to_hbm [thread:$0]  (%p1603_p5), %s1898_s8, 16, %s1896_s14, %s1108_s15  }
 0x3ed PF: > { %p1369_p1 = scmp.ge.s32.totalorder %s1521_s27, 2  ;;  %s1132_s9 = sand.u32 1, %s1509_s24  }
 0x3ee   : > { %s1133_s13 = scalar_lea.sflag [#allocation3], %s1132_s9 }
 0x3ef   : > { %p1366_p2 = pnand %p1369_p1, %p1607_p6 }
 0x3f1   : > { %1504 = dma.done.wait (!%p1366_p2), %s1133_s13, 16  }
 0x3f2   : > { %1506 = vsyncadd (!%p1366_p2), %s1133_s13, 4294967280  ;;  %p17_p3 = scmp.ge.s32.totalorder %s1590_s30, 4   ;;  %s1948_s24 = smov %s1513_s25 }
 0x3f3   : > { %s1949_s25 = smov %s1517_s26  ;;  %s1950_s26 = smov %s1601_s10 }
 0x3f4   : > { %s1951_s27 = smov %s1590_s30  ;;  %19 = sbr.rel (!%p17_p3) target bundleno = 3 (0x3), region = 86 }
 0x3fb   :  { %1137 = vsyncpa [#allocation3], 1 }
 0x3fc   :  { %1139 = vsyncpa [#allocation3 + $0x1], 1 }

</bundles_post_ra>
